<compile_context>
chip_gen: v6e
topology: v6e:2x2x1
jax: 0.10.0
libtpu: 0.0.40
codegen_flags: <defaults>
</compile_context>

<pallas_src>
import functools

import jax
import jax.numpy as jnp
from jax.experimental import pallas as pl
from jax.experimental.pallas import tpu as pltpu

_LANES = 128


def _bce_dice_partials_kernel(x_ref, t_ref, out_ref, *, n, tile_rows,
                              tiles_per_split):
    c = pl.program_id(0)          # row-range split (parallel across TCs on v7x)
    i = pl.program_id(1)          # tile index inside the split (reduction axis)

    @pl.when(i == 0)
    def _():
        out_ref[...] = jnp.zeros_like(out_ref)

    x = x_ref[...].astype(jnp.float32)
    t = t_ref[...].astype(jnp.float32)

    # In-kernel validity mask from the static element count `n`
    # (replaces the old third HBM mask stream).
    tile = c * tiles_per_split + i
    row = jax.lax.broadcasted_iota(jnp.int32, (tile_rows, _LANES), 0)
    lane = jax.lax.broadcasted_iota(jnp.int32, (tile_rows, _LANES), 1)
    flat_row = tile * tile_rows + row
    full_rows = n // _LANES           # static Python ints
    rem = n % _LANES
    valid = (flat_row < full_rows) | ((flat_row == full_rows) & (lane < rem))

    # Shared transcendental: e = exp(-|x|)
    e = jnp.exp(-jnp.abs(x))
    # Numerically stable BCE-with-logits: max(x,0) - x*t + log1p(e)
    bce = jnp.maximum(x, 0.0) - x * t + jnp.log1p(e)
    # sigmoid(x): 1/(1+e) for x>=0, e/(1+e) for x<0  (reuses e, exact recip)
    inv = 1.0 / (1.0 + e)
    probs = jnp.where(x >= 0.0, inv, e * inv)

    # Use where (not multiply) so garbage in out-of-range tails can't make NaN.
    bce = jnp.where(valid, bce, 0.0)
    probs = jnp.where(valid, probs, 0.0)
    tgt = jnp.where(valid, t, 0.0)
    inter = probs * tgt

    # Reduce the (tile_rows,128) tile to an (8,128) vector partial with pure
    # VPU vreg adds; the cross-lane (XLU) reduce happens once, outside.
    def part(v):
        return jnp.sum(v.reshape(tile_rows // 8, 8, _LANES), axis=0)

    out_ref[0, 0, :, :] += part(bce)
    out_ref[0, 1, :, :] += part(probs)
    out_ref[0, 2, :, :] += part(tgt)
    out_ref[0, 3, :, :] += part(inter)


def bce_dice_loss(inputs, targets, bce_weight=0.5, smooth=1e-06, *,
                  tile_rows=1024):
    """Combined BCE + Dice loss matching BCEDiceLoss.forward semantics."""
    if not jnp.issubdtype(targets.dtype, jnp.floating):
        targets = targets.astype(inputs.dtype)   # keep the HBM stream narrow

    x = inputs.reshape(-1)
    t = targets.reshape(-1)
    n = x.shape[0]

    # Pad (only if needed) to a multiple of 8*128 so the slab is a whole number
    # of aligned sublane rows; the in-kernel mask zeroes the <=1023 pad values.
    block_align = 8 * _LANES
    pad = (-n) % block_align
    if pad:
        x = jnp.pad(x, (0, pad))
        t = jnp.pad(t, (0, pad))
    rows = (n + pad) // _LANES               # multiple of 8, >= 8
    x = x.reshape(rows, _LANES)
    t = t.reshape(rows, _LANES)

    # Tile size: multiple of 8 sublanes, never taller than the slab.
    tile_rows = max(8, (tile_rows // 8) * 8)
    tr = min(tile_rows, rows)
    total_tiles = pl.cdiv(rows, tr)
    n_split = 2 if total_tiles >= 2 else 1   # feed both TensorCores on v7x
    tiles_per_split = pl.cdiv(total_tiles, n_split)
    grid = (n_split, tiles_per_split)

    def in_map(c, i):
        # Clamp so a split that runs past the end re-reads the last tile; the
        # in-kernel validity mask zeroes its contribution.
        return (jnp.minimum(c * tiles_per_split + i, total_tiles - 1), 0)

    in_spec = pl.BlockSpec((tr, _LANES), in_map)
    out_spec = pl.BlockSpec((1, 4, 8, _LANES), lambda c, i: (c, 0, 0, 0))

    kernel = functools.partial(_bce_dice_partials_kernel, n=n, tile_rows=tr,
                               tiles_per_split=tiles_per_split)

    partials = pl.pallas_call(
        kernel,
        out_shape=jax.ShapeDtypeStruct((n_split, 4, 8, _LANES), jnp.float32),
        grid=grid,
        in_specs=[in_spec, in_spec],
        out_specs=out_spec,
        compiler_params=pltpu.CompilerParams(
            dimension_semantics=("parallel", "arbitrary")),
    )(x, t)

    # Tiny final reduction + scalar combine in JAX.
    sums = jnp.sum(partials, axis=(0, 2, 3))          # (4,)
    bce_sum, probs_sum, targets_sum, inter_sum = (sums[0], sums[1],
                                                  sums[2], sums[3])

    bce_loss = bce_sum / jnp.float32(n)               # mean reduction
    dice = (2.0 * inter_sum + smooth) / (probs_sum + targets_sum + smooth)
    dice_loss = 1.0 - dice
    return bce_weight * bce_loss + (1.0 - bce_weight) * dice_loss


def _reference(inputs, targets, bce_weight=0.5, smooth=1e-06):
    x = inputs.reshape(-1).astype(jnp.float32)
    t = targets.reshape(-1).astype(jnp.float32)
    bce = jnp.mean(jnp.maximum(x, 0.0) - x * t + jnp.log1p(jnp.exp(-jnp.abs(x))))
    p = jax.nn.sigmoid(x)
    inter = jnp.sum(p * t)
    dice = (2.0 * inter + smooth) / (jnp.sum(p) + jnp.sum(t) + smooth)
    return bce_weight * bce + (1.0 - bce_weight) * (1.0 - dice)


if __name__ == "__main__":
    key = jax.random.PRNGKey(0)
    k1, k2 = jax.random.split(key)

    # Small synthetic segmentation-style batch: NCHW logits + binary targets.
    B, C, H, W = 2, 4, 16, 16
    logits = jax.random.normal(k1, (B, C, H, W), dtype=jnp.float32)
    targets = (jax.random.uniform(k2, (B, C, H, W)) > 0.5).astype(jnp.float32)

    loss = bce_dice_loss(logits, targets)
    loss = jax.block_until_ready(loss)

    ref = jax.block_until_ready(_reference(logits, targets))
    assert jnp.allclose(loss, ref, rtol=1e-5, atol=1e-5), (loss, ref)

    print("KERNEL_OK")
</pallas_src>

<mosaic_0001>
module attributes {stable_mosaic.version = 11 : i64} {
  func.func @_bce_dice_partials_kernel(%arg0: i32, %arg1: i32, %arg2: memref<16x128xf32, #tpu.memory_space<vmem>>, %arg3: memref<16x128xf32, #tpu.memory_space<vmem>>, %arg4: memref<1x4x8x128xf32, #tpu.memory_space<vmem>>) attributes {dimension_semantics = [#tpu.dimension_semantics<parallel>, #tpu.dimension_semantics<arbitrary>], iteration_bounds = array<i64: 1, 1>, scalar_prefetch = 0 : i64, scratch_operands = 0 : i64, tpu.core_type = #tpu.core_type<tc>, window_params = [{transform_indices = @transform_0, window_bounds = array<i64: 16, 128>}, {transform_indices = @transform_1, window_bounds = array<i64: 16, 128>}, {transform_indices = @transform_2, window_bounds = array<i64: 1, 4, 8, 128>}]} {
    %c0_i32 = arith.constant 0 : i32
    %0 = arith.cmpi eq, %arg1, %c0_i32 : i32
    %1 = arith.extui %0 : i1 to i32
    %c0_i32_0 = arith.constant 0 : i32
    %2 = arith.cmpi ne, %1, %c0_i32_0 : i32
    scf.if %2 {
      %cst_47 = arith.constant 0.000000e+00 : f32
      %77 = vector.broadcast %cst_47 : f32 to vector<1x4x8x128xf32>
      %c0_48 = arith.constant 0 : index
      %c0_49 = arith.constant 0 : index
      %c0_50 = arith.constant 0 : index
      %c0_51 = arith.constant 0 : index
      %78 = vector.load %arg4[%c0_48, %c0_49, %c0_50, %c0_51] : memref<1x4x8x128xf32, #tpu.memory_space<vmem>>, vector<1x4x8x128xf32>
      tpu.vector_store %arg4[%c0_48, %c0_49, %c0_50, %c0_51], %77 {strides = array<i32>} : memref<1x4x8x128xf32, #tpu.memory_space<vmem>>, vector<1x4x8x128xf32>,
    } else {
    }
    %c0 = arith.constant 0 : index
    %c0_1 = arith.constant 0 : index
    %3 = vector.load %arg2[%c0, %c0_1] : memref<16x128xf32, #tpu.memory_space<vmem>>, vector<16x128xf32>
    %c0_2 = arith.constant 0 : index
    %c0_3 = arith.constant 0 : index
    %4 = vector.load %arg3[%c0_2, %c0_3] : memref<16x128xf32, #tpu.memory_space<vmem>>, vector<16x128xf32>
    %c1_i32 = arith.constant 1 : i32
    %5 = arith.muli %arg0, %c1_i32 : i32
    %6 = arith.addi %5, %arg1 : i32
    %7 = tpu.iota {dimensions = array<i32: 0>} : vector<16x128xi32>
    %8 = tpu.iota {dimensions = array<i32: 1>} : vector<16x128xi32>
    %c16_i32 = arith.constant 16 : i32
    %9 = arith.muli %6, %c16_i32 : i32
    %10 = vector.broadcast %9 : i32 to vector<16x128xi32>
    %11 = arith.addi %10, %7 : vector<16x128xi32>
    %c16_i32_4 = arith.constant 16 : i32
    %12 = vector.broadcast %c16_i32_4 : i32 to vector<16x128xi32>
    %13 = arith.cmpi slt, %11, %12 : vector<16x128xi32>
    %c16_i32_5 = arith.constant 16 : i32
    %14 = vector.broadcast %c16_i32_5 : i32 to vector<16x128xi32>
    %15 = arith.cmpi eq, %11, %14 : vector<16x128xi32>
    %c0_i32_6 = arith.constant 0 : i32
    %16 = vector.broadcast %c0_i32_6 : i32 to vector<16x128xi32>
    %17 = arith.cmpi slt, %8, %16 : vector<16x128xi32>
    %18 = arith.andi %15, %17 : vector<16x128xi1>
    %19 = arith.ori %13, %18 : vector<16x128xi1>
    %20 = math.absf %3 : vector<16x128xf32>
    %cst = arith.constant 0.000000e+00 : f32
    %21 = vector.broadcast %cst : f32 to vector<16x128xf32>
    %22 = arith.subf %21, %20 : vector<16x128xf32>
    %23 = math.exp %22 : vector<16x128xf32>
    %cst_7 = arith.constant 0.000000e+00 : f32
    %24 = vector.broadcast %cst_7 : f32 to vector<16x128xf32>
    %25 = arith.maximumf %3, %24 : vector<16x128xf32>
    %26 = arith.mulf %3, %4 : vector<16x128xf32>
    %27 = arith.subf %25, %26 : vector<16x128xf32>
    %28 = math.log1p %23 : vector<16x128xf32>
    %29 = arith.addf %27, %28 : vector<16x128xf32>
    %cst_8 = arith.constant 1.000000e+00 : f32
    %30 = vector.broadcast %cst_8 : f32 to vector<16x128xf32>
    %31 = arith.addf %30, %23 : vector<16x128xf32>
    %cst_9 = arith.constant 1.000000e+00 : f32
    %32 = vector.broadcast %cst_9 : f32 to vector<16x128xf32>
    %33 = arith.divf %32, %31 : vector<16x128xf32>
    %cst_10 = arith.constant 0.000000e+00 : f32
    %34 = vector.broadcast %cst_10 : f32 to vector<16x128xf32>
    %35 = arith.cmpf oge, %3, %34 : vector<16x128xf32>
    %36 = arith.mulf %23, %33 : vector<16x128xf32>
    %37 = arith.select %35, %33, %36 : vector<16x128xi1>, vector<16x128xf32>
    %cst_11 = arith.constant 0.000000e+00 : f32
    %38 = vector.broadcast %cst_11 : f32 to vector<16x128xf32>
    %39 = arith.select %19, %29, %38 : vector<16x128xi1>, vector<16x128xf32>
    %cst_12 = arith.constant 0.000000e+00 : f32
    %40 = vector.broadcast %cst_12 : f32 to vector<16x128xf32>
    %41 = arith.select %19, %37, %40 : vector<16x128xi1>, vector<16x128xf32>
    %cst_13 = arith.constant 0.000000e+00 : f32
    %42 = vector.broadcast %cst_13 : f32 to vector<16x128xf32>
    %43 = arith.select %19, %4, %42 : vector<16x128xi1>, vector<16x128xf32>
    %44 = arith.mulf %41, %43 : vector<16x128xf32>
    %c0_14 = arith.constant 0 : index
    %c0_15 = arith.constant 0 : index
    %c0_16 = arith.constant 0 : index
    %c0_17 = arith.constant 0 : index
    %45 = vector.load %arg4[%c0_14, %c0_15, %c0_16, %c0_17] : memref<1x4x8x128xf32, #tpu.memory_space<vmem>>, vector<1x1x8x128xf32>
    %46 = vector.shape_cast %45 : vector<1x1x8x128xf32> to vector<8x128xf32>
    %47 = vector.shape_cast %39 : vector<16x128xf32> to vector<2x8x128xf32>
    %cst_18 = arith.constant dense<0.000000e+00> : vector<8x128xf32>
    %48 = vector.multi_reduction <add>, %47, %cst_18 [0] : vector<2x8x128xf32> to vector<8x128xf32>
    %49 = arith.addf %46, %48 : vector<8x128xf32>
    %c0_19 = arith.constant 0 : index
    %c0_20 = arith.constant 0 : index
    %c0_21 = arith.constant 0 : index
    %c0_22 = arith.constant 0 : index
    %50 = vector.load %arg4[%c0_19, %c0_20, %c0_21, %c0_22] : memref<1x4x8x128xf32, #tpu.memory_space<vmem>>, vector<1x1x8x128xf32>
    %51 = vector.shape_cast %50 : vector<1x1x8x128xf32> to vector<8x128xf32>
    %52 = vector.shape_cast %49 : vector<8x128xf32> to vector<1x1x8x128xf32>
    tpu.vector_store %arg4[%c0_19, %c0_20, %c0_21, %c0_22], %52 {strides = array<i32>} : memref<1x4x8x128xf32, #tpu.memory_space<vmem>>, vector<1x1x8x128xf32>,
    %c0_23 = arith.constant 0 : index
    %c1 = arith.constant 1 : index
    %c0_24 = arith.constant 0 : index
    %c0_25 = arith.constant 0 : index
    %53 = vector.load %arg4[%c0_23, %c1, %c0_24, %c0_25] : memref<1x4x8x128xf32, #tpu.memory_space<vmem>>, vector<1x1x8x128xf32>
    %54 = vector.shape_cast %53 : vector<1x1x8x128xf32> to vector<8x128xf32>
    %55 = vector.shape_cast %41 : vector<16x128xf32> to vector<2x8x128xf32>
    %cst_26 = arith.constant dense<0.000000e+00> : vector<8x128xf32>
    %56 = vector.multi_reduction <add>, %55, %cst_26 [0] : vector<2x8x128xf32> to vector<8x128xf32>
    %57 = arith.addf %54, %56 : vector<8x128xf32>
    %c0_27 = arith.constant 0 : index
    %c1_28 = arith.constant 1 : index
    %c0_29 = arith.constant 0 : index
    %c0_30 = arith.constant 0 : index
    %58 = vector.load %arg4[%c0_27, %c1_28, %c0_29, %c0_30] : memref<1x4x8x128xf32, #tpu.memory_space<vmem>>, vector<1x1x8x128xf32>
    %59 = vector.shape_cast %58 : vector<1x1x8x128xf32> to vector<8x128xf32>
    %60 = vector.shape_cast %57 : vector<8x128xf32> to vector<1x1x8x128xf32>
    tpu.vector_store %arg4[%c0_27, %c1_28, %c0_29, %c0_30], %60 {strides = array<i32>} : memref<1x4x8x128xf32, #tpu.memory_space<vmem>>, vector<1x1x8x128xf32>,
    %c0_31 = arith.constant 0 : index
    %c2 = arith.constant 2 : index
    %c0_32 = arith.constant 0 : index
    %c0_33 = arith.constant 0 : index
    %61 = vector.load %arg4[%c0_31, %c2, %c0_32, %c0_33] : memref<1x4x8x128xf32, #tpu.memory_space<vmem>>, vector<1x1x8x128xf32>
    %62 = vector.shape_cast %61 : vector<1x1x8x128xf32> to vector<8x128xf32>
    %63 = vector.shape_cast %43 : vector<16x128xf32> to vector<2x8x128xf32>
    %cst_34 = arith.constant dense<0.000000e+00> : vector<8x128xf32>
    %64 = vector.multi_reduction <add>, %63, %cst_34 [0] : vector<2x8x128xf32> to vector<8x128xf32>
    %65 = arith.addf %62, %64 : vector<8x128xf32>
    %c0_35 = arith.constant 0 : index
    %c2_36 = arith.constant 2 : index
    %c0_37 = arith.constant 0 : index
    %c0_38 = arith.constant 0 : index
    %66 = vector.load %arg4[%c0_35, %c2_36, %c0_37, %c0_38] : memref<1x4x8x128xf32, #tpu.memory_space<vmem>>, vector<1x1x8x128xf32>
    %67 = vector.shape_cast %66 : vector<1x1x8x128xf32> to vector<8x128xf32>
    %68 = vector.shape_cast %65 : vector<8x128xf32> to vector<1x1x8x128xf32>
    tpu.vector_store %arg4[%c0_35, %c2_36, %c0_37, %c0_38], %68 {strides = array<i32>} : memref<1x4x8x128xf32, #tpu.memory_space<vmem>>, vector<1x1x8x128xf32>,
    %c0_39 = arith.constant 0 : index
    %c3 = arith.constant 3 : index
    %c0_40 = arith.constant 0 : index
    %c0_41 = arith.constant 0 : index
    %69 = vector.load %arg4[%c0_39, %c3, %c0_40, %c0_41] : memref<1x4x8x128xf32, #tpu.memory_space<vmem>>, vector<1x1x8x128xf32>
    %70 = vector.shape_cast %69 : vector<1x1x8x128xf32> to vector<8x128xf32>
    %71 = vector.shape_cast %44 : vector<16x128xf32> to vector<2x8x128xf32>
    %cst_42 = arith.constant dense<0.000000e+00> : vector<8x128xf32>
    %72 = vector.multi_reduction <add>, %71, %cst_42 [0] : vector<2x8x128xf32> to vector<8x128xf32>
    %73 = arith.addf %70, %72 : vector<8x128xf32>
    %c0_43 = arith.constant 0 : index
    %c3_44 = arith.constant 3 : index
    %c0_45 = arith.constant 0 : index
    %c0_46 = arith.constant 0 : index
    %74 = vector.load %arg4[%c0_43, %c3_44, %c0_45, %c0_46] : memref<1x4x8x128xf32, #tpu.memory_space<vmem>>, vector<1x1x8x128xf32>
    %75 = vector.shape_cast %74 : vector<1x1x8x128xf32> to vector<8x128xf32>
    %76 = vector.shape_cast %73 : vector<8x128xf32> to vector<1x1x8x128xf32>
    tpu.vector_store %arg4[%c0_43, %c3_44, %c0_45, %c0_46], %76 {strides = array<i32>} : memref<1x4x8x128xf32, #tpu.memory_space<vmem>>, vector<1x1x8x128xf32>,
    return
  }
  func.func @transform_0(%arg0: i32, %arg1: i32) -> (i32, i32) {
    %c1_i32 = arith.constant 1 : i32
    %0 = arith.muli %arg0, %c1_i32 : i32
    %1 = arith.addi %0, %arg1 : i32
    %c0_i32 = arith.constant 0 : i32
    %2 = arith.minsi %1, %c0_i32 : i32
    %c0_i32_0 = arith.constant 0 : i32
    %c0_i32_1 = arith.constant 0 : i32
    return %2, %c0_i32_0 : i32, i32
  }
  func.func @transform_1(%arg0: i32, %arg1: i32) -> (i32, i32) {
    %c1_i32 = arith.constant 1 : i32
    %0 = arith.muli %arg0, %c1_i32 : i32
    %1 = arith.addi %0, %arg1 : i32
    %c0_i32 = arith.constant 0 : i32
    %2 = arith.minsi %1, %c0_i32 : i32
    %c0_i32_0 = arith.constant 0 : i32
    %c0_i32_1 = arith.constant 0 : i32
    return %2, %c0_i32_0 : i32, i32
  }
  func.func @transform_2(%arg0: i32, %arg1: i32) -> (i32, i32, i32, i32) {
    %c0_i32 = arith.constant 0 : i32
    %c0_i32_0 = arith.constant 0 : i32
    %c0_i32_1 = arith.constant 0 : i32
    %c0_i32_2 = arith.constant 0 : i32
    return %arg0, %c0_i32, %c0_i32_0, %c0_i32_1 : i32, i32, i32, i32
  }
}

</mosaic_0001>

<bundles_post_ra>
// kernel: tpu_custom_call.1
= control target key start
LH: loop header
LB: loop body
LE: loop exit
PB: predicated region body
PF: predicated region fallthrough
CT: control target
= control target key end

     0   :  { %7 = vsyncpa [#allocation3], 0  ;;  %s308_s0 = inlined_call_operand.hbm [shape: f32[16,128], index: 0, kind: input, shape index: {}]   ;;  %s309_s1 = inlined_call_operand.hbm [shape: f32[16,128], index: 1, kind: input, shape index: {}]   ;;  %s310_s2 = inlined_call_operand.hbm [shape: f32[1,4,8,128], index: 2, kind: output, shape index: {}]  }
   0x1   :  { %8 = vsyncpa [#allocation6], 0 }
   0x2   :  { %9 = vsyncpa [#allocation4], 0  ;;  %s270_s9 = smov [#allocation2]  }
   0x3   :  { %s21_s10 = sshll.u32 %s270_s9, 4  ;;  %s22_s10 = int_to_ptr.vmem [resolvable:$true] %s21_s10 }
   0x4   :  { %s212_s11 = scalar_lea.vmem %s22_s10, 256  ;;  %p217_p1 = scmp.lt.s32.totalorder %s22_s10, %s22_s10 }
   0x5   :  { %p213_p0 = scmp.ne.s32.totalorder %s22_s10, %s212_s11  ;;  %p218_p2 = scmp.lt.s32.totalorder %s212_s11, %s212_s11 }
   0x7   :  { %p219_p3 = por %p218_p2, %p217_p1 }
   0x9   :  { %p220_p4 = pnand %p219_p3, %p213_p0 }
   0xb   :  { %223 = shalt.err (!%p220_p4)
}
   0xc   :  { %s271_s12 = smov 128   ;;  %s272_s13 = smov 8  }
   0xd   :  { %27 = dma.hbm_to_vmem [thread:$0]  %s308_s0, 256, %s22_s10, [#allocation3], %s271_s12, %s271_s12, %s272_s13  }
   0xe   :  { %s273_s16 = smov [#allocation5]  }
   0xf   :  { %s39_s17 = sshll.u32 %s273_s16, 4  ;;  %s40_s17 = int_to_ptr.vmem [resolvable:$true] %s39_s17 }
  0x10   :  { %s232_s18 = scalar_lea.vmem %s40_s17, 256  ;;  %p237_p6 = scmp.lt.s32.totalorder %s40_s17, %s40_s17 }
  0x11   :  { %p233_p5 = scmp.ne.s32.totalorder %s40_s17, %s232_s18  ;;  %p238_p7 = scmp.lt.s32.totalorder %s232_s18, %s232_s18 }
  0x13   :  { %p239_p8 = por %p238_p7, %p237_p6 }
  0x15   :  { %p240_p9 = pnand %p239_p8, %p233_p5 }
  0x17   :  { %243 = shalt.err (!%p240_p9)
}
  0x18   :  { %45 = dma.hbm_to_vmem [thread:$0]  %s309_s1, 256, %s40_s17, [#allocation6], %s271_s12, %s271_s12, %s272_s13  }
  0x19   :  { %264 = dma.done.wait [#allocation3], 256  }
  0x1a   :  { %265 = vsyncadd [#allocation3], 4294967040 }
  0x1b   :  { %266 = dma.done.wait [#allocation6], 256  }
  0x1c   :  { %267 = vsyncadd [#allocation6], 4294967040  ;;  %v68_v0 = vld [vmem:[#allocation2] sm:$0xff]  ;;  %v69_v1 = vld [vmem:[#allocation2 + $0x8] sm:$0xff]  ;;  %s274_s0 = smov [#allocation7]  }
  0x1d   :  { %v91_v2 = vand.u32 2147483647, %v68_v0  ;;  %v92_v3 = vand.u32 2147483647, %v69_v1  ;;  %v70_v4 = vld [vmem:[#allocation5] sm:$0xff]  ;;  %v71_v5 = vld [vmem:[#allocation5 + $0x8] sm:$0xff] }
  0x1e   :  { %v156_v8 = vadd.f32 %v71_v5, %v70_v4  ;;  %v99_v18 = vmax.f32 %v68_v0, 0.0  ;;  %v101_v19 = vmul.f32 %v70_v4, %v68_v0  ;;  %v100_v22 = vmax.f32 %v69_v1, 0.0  ;;  %s169_s1 = sshll.u32 %s274_s0, 4  ;;  %s170_s1 = int_to_ptr.vmem [resolvable:$true] %s169_s1 }
  0x1f   :  { %v93_v6 = vsub.f32 0.0, %v91_v2  ;;  %v94_v7 = vsub.f32 0.0, %v92_v3  ;;  %v102_v23 = vmul.f32 %v71_v5, %v69_v1  ;;  %vm131_vm2 = vcmp.ge.f32.partialorder %v68_v0, 0.0  ;;  %s244_s21 = scalar_lea.vmem %s170_s1, 512  ;;  %p249_p11 = scmp.lt.s32.totalorder %s170_s1, %s170_s1 }
  0x20   :  { %158 = vst [vmem:[#allocation7 + $0x10] sm:$0xff] %v156_v8  ;;  %v103_v27 = vsub.f32 %v99_v18, %v101_v19  ;;  %vm132_vm3 = vcmp.ge.f32.partialorder %v69_v1, 0.0  ;;  %p245_p10 = scmp.ne.s32.totalorder %s170_s1, %s244_s21  ;;  %p250_p12 = scmp.lt.s32.totalorder %s244_s21, %s244_s21 }
  0x21   :  { %v95_v9 = vmul.f32 1.442695, %v93_v6  ;;  %v97_v10 = vmul.f32 1.442695, %v94_v7  ;;  %v104_v30 = vsub.f32 %v100_v22, %v102_v23 }
  0x22   :  { %p251_p13 = por %p250_p12, %p249_p11 }
  0x23   :  { %192 = vpow2.f32 %v95_v9 }
  0x24   :  { %194 = vpow2.f32 %v97_v10  ;;  %p252_p0 = pnand %p251_p13, %p245_p10 }
  0x30   :  { %v193_v11 = vpop.eup %192 }
  0x31   :  { %v195_v12 = vpop.eup %194  ;;  %v105_v13 = vadd.f32 1.0, %v193_v11  ;;  %v108_v15 = vmul.f32 -0.5, %v193_v11  ;;  %v111_v20 = vand.u32 2147483647, %v193_v11 }
  0x32   :  { %v114_v14 = vadd.f32 1.0, %v195_v12  ;;  %v117_v16 = vmul.f32 -0.5, %v195_v12  ;;  %v120_v24 = vand.u32 2147483647, %v195_v12 }
  0x33   :  { %196 = vlog2.f32 %v105_v13  ;;  %v109_v17 = vadd.f32 1.0, %v108_v15  ;;  %vm112_vm0 = vcmp.lt.f32.partialorder %v111_v20, 0.0004427343 }
  0x34   :  { %198 = vlog2.f32 %v114_v14  ;;  %v118_v21 = vadd.f32 1.0, %v117_v16  ;;  %vm121_vm1 = vcmp.lt.f32.partialorder %v120_v24, 0.0004427343 }
  0x35   :  { %200 = vrcp.f32 %v105_v13  ;;  %v110_v25 = vmul.f32 %v193_v11, %v109_v17 }
  0x36   :  { %202 = vrcp.f32 %v114_v14  ;;  %v119_v28 = vmul.f32 %v195_v12, %v118_v21 }
  0x40   :  { %v197_v26 = vpop.eup %196 }
  0x41   :  { %v199_v29 = vpop.eup %198  ;;  %v107_v31 = vmul.f32 0.6931472, %v197_v26 }
  0x42   :  { %v201_v32 = vpop.eup %200  ;;  %v116_v33 = vmul.f32 0.6931472, %v199_v29 }
  0x43   :  { %v203_v34 = vpop.eup %202  ;;  %v113_v35 = vsel %vm112_vm0, %v110_v25, %v107_v31  ;;  %v133_v36 = vmul.f32 %v201_v32, %v193_v11 }
  0x44   :  { %v122_v37 = vsel %vm121_vm1, %v119_v28, %v116_v33  ;;  %v123_v38 = vadd.f32 %v113_v35, %v103_v27  ;;  %v134_v39 = vmul.f32 %v203_v34, %v195_v12 }
  0x45   :  { %v124_v40 = vadd.f32 %v122_v37, %v104_v30  ;;  %v135_v41 = vsel %vm131_vm2, %v201_v32, %v133_v36 }
  0x46   :  { %v136_v42 = vsel %vm132_vm3, %v203_v34, %v134_v39  ;;  %v143_v43 = vmul.f32 %v135_v41, %v70_v4 }
  0x47   :  { %v146_v44 = vadd.f32 %v124_v40, %v123_v38  ;;  %v151_v45 = vadd.f32 %v136_v42, %v135_v41  ;;  %v144_v46 = vmul.f32 %v136_v42, %v71_v5 }
  0x49   :  { %v161_v47 = vadd.f32 %v144_v46, %v143_v43  ;;  %148 = vst [vmem:[#allocation7] sm:$0xff] %v146_v44  ;;  %153 = vst [vmem:[#allocation7 + $0x8] sm:$0xff] %v151_v45 }
  0x4b   :  { %163 = vst [vmem:[#allocation7 + $0x18] sm:$0xff] %v161_v47 }
  0x4c   :  { %255 = shalt.err (!%p252_p0)
}
  0x4d   :  { %175 = dma.vmem_to_hbm [thread:$0]  %s170_s1, 512, %s310_s2, [#allocation4], %s271_s12, %s271_s12, %s272_s13  }
  0x4e   :  { %268 = dma.done.wait [#allocation4], 512  }
  0x4f   :  { %269 = vsyncadd [#allocation4], 4294966784 }
  0x50   :  { %179 = vsyncpa [#allocation3], 1 }
  0x51   :  { %180 = vsyncpa [#allocation6], 1 }
  0x52   :  { %181 = vsyncpa [#allocation4], 1 }

</bundles_post_ra>
